<compile_context>
chip_gen: v7x
topology: tpu7x:2x2x1
jax: 0.10.0
libtpu: 0.0.40
codegen_flags: <defaults>
</compile_context>

<pallas_src>
import random

import jax
import jax.numpy as jnp
from jax.experimental import pallas as pl
from jax.experimental.pallas import tpu as pltpu


# ---------------------------------------------------------------------------
# Pallas kernel: per-row affine  y = x * gain_row + bias_row
# ---------------------------------------------------------------------------
def _affine_kernel(gain_ref, bias_ref, x_ref, o_ref):
    # gain_ref / bias_ref: (tile_R, 1); x_ref / o_ref: (tile_R, tile_L)
    o_ref[...] = x_ref[...] * gain_ref[...] + bias_ref[...]


def _sublane_align(dtype) -> int:
    # fp32 -> 8 sublanes, bf16 -> 16, int8/fp8 -> 32 (packed sublanes).
    return 8 * (4 // max(1, jnp.dtype(dtype).itemsize))


def _pick_tile(dim: int, target: int, align: int) -> int:
    """Largest aligned tile <= target, or the full dim if it already fits."""
    if dim <= target:
        return dim                      # full extent is always a legal block dim
    return max(align, (target // align) * align)


def apply_affine(x_nchw, gain_c, bias_c):
    """The wrapped fn(x): per-channel affine jitter, as a tiled Pallas kernel."""
    N, C, H, W = x_nchw.shape
    R, L = N * C, H * W
    x2d = x_nchw.reshape(R, L)

    # Per-row (= per (batch, channel)) params; tiny (R x 1) arrays, row-tiled below.
    gain = jnp.tile(gain_c.astype(x2d.dtype), N).reshape(R, 1)
    bias = jnp.tile(bias_c.astype(x2d.dtype), N).reshape(R, 1)

    # Lane-dense streaming tiles: <= 256 rows x 2048 lanes (2 MiB for fp32).
    # With double-buffered x + out that is ~8 MiB of pipeline VMEM — fits the
    # 16 MiB v5e scoped default and leaves headroom on v7x's 64 MiB physical.
    row_align = _sublane_align(x2d.dtype)
    tile_r = _pick_tile(R, 256, row_align)
    tile_l = _pick_tile(L, 2048, 128)
    grid = (pl.cdiv(R, tile_r), pl.cdiv(L, tile_l))   # partial edge blocks are masked

    out2d = pl.pallas_call(
        _affine_kernel,
        out_shape=jax.ShapeDtypeStruct((R, L), x2d.dtype),
        grid=grid,
        in_specs=[
            pl.BlockSpec((tile_r, 1), lambda i, j: (i, 0)),        # gain (row-tiled)
            pl.BlockSpec((tile_r, 1), lambda i, j: (i, 0)),        # bias (row-tiled)
            pl.BlockSpec((tile_r, tile_l), lambda i, j: (i, j)),   # x
        ],
        out_specs=pl.BlockSpec((tile_r, tile_l), lambda i, j: (i, j)),
        compiler_params=pltpu.CompilerParams(
            dimension_semantics=("parallel", "parallel"),
            vmem_limit_bytes=64 * 1024 * 1024,
        ),
    )(gain, bias, x2d)

    return out2d.reshape(N, C, H, W)


# ---------------------------------------------------------------------------
# RandomApply.forward equivalent
# ---------------------------------------------------------------------------
def random_apply_forward(x, *, gain_c, bias_c, p, rng=None):
    """Pallas equivalent of RandomApply.forward.

    The Bernoulli draw is host-side Python `random` (exactly like the PyTorch
    module), so the passthrough branch launches no kernel and moves no bytes.
    Returns (out, aug_list).
    """
    if isinstance(x, tuple):
        x, aug_list = x
    else:
        aug_list = []

    draw = rng.random() if rng is not None else random.random()
    if draw > p:
        aug_list.append(False)
        return x, aug_list          # passthrough: zero HBM traffic, x aliased as-is

    aug_list.append(True)
    return apply_affine(x, gain_c, bias_c), aug_list


# ---------------------------------------------------------------------------
# Self-test
# ---------------------------------------------------------------------------
if __name__ == "__main__":
    key = jax.random.PRNGKey(0)
    N, C, H, W = 2, 4, 16, 16
    x = jax.random.normal(key, (N, C, H, W), dtype=jnp.float32)

    # Deterministic parameters of the wrapped fn (per-channel affine jitter).
    gain_c = 1.0 + 0.1 * jnp.arange(C, dtype=jnp.float32)
    bias_c = 0.01 * jnp.arange(C, dtype=jnp.float32)

    rng = random.Random(0)

    # --- applied branch (p = 1.0 => fn always applied): exercises the kernel ---
    out, aug = random_apply_forward((x, []), gain_c=gain_c, bias_c=bias_c, p=1.0, rng=rng)
    out = jax.block_until_ready(out)
    ref = x * gain_c.reshape(1, C, 1, 1) + bias_c.reshape(1, C, 1, 1)
    assert aug == [True], aug
    assert jnp.allclose(out, ref, atol=1e-6), "kernel mismatch vs reference (applied path)"

    # --- passthrough branch (p = 0.0): no kernel launch, x returned unchanged ---
    out2, aug2 = random_apply_forward((x, aug), gain_c=gain_c, bias_c=bias_c, p=0.0, rng=rng)
    assert aug2 == [True, False], aug2
    assert out2 is x, "passthrough must return the input without touching it"

    # --- larger-than-one-tile shape: exercises multi-block grid + remainder masking ---
    N2, C2, H2, W2 = 2, 3, 48, 48            # L = 2304 > 2048 -> 2 lane tiles, partial edge
    x_big = jax.random.normal(jax.random.PRNGKey(1), (N2, C2, H2, W2), dtype=jnp.float32)
    g2 = 1.0 + 0.05 * jnp.arange(C2, dtype=jnp.float32)
    b2 = 0.02 * jnp.arange(C2, dtype=jnp.float32)
    out_big = jax.block_until_ready(apply_affine(x_big, g2, b2))
    ref_big = x_big * g2.reshape(1, C2, 1, 1) + b2.reshape(1, C2, 1, 1)
    assert jnp.allclose(out_big, ref_big, atol=1e-6), "kernel mismatch vs reference (tiled path)"

    print("KERNEL_OK")
</pallas_src>

<mosaic_0001>
module attributes {stable_mosaic.version = 11 : i64} {
  func.func @_affine_kernel(%arg0: i32, %arg1: i32, %arg2: memref<8x1xf32, #tpu.memory_space<vmem>>, %arg3: memref<8x1xf32, #tpu.memory_space<vmem>>, %arg4: memref<8x256xf32, #tpu.memory_space<vmem>>, %arg5: memref<8x256xf32, #tpu.memory_space<vmem>>) attributes {dimension_semantics = [#tpu.dimension_semantics<parallel>, #tpu.dimension_semantics<parallel>], iteration_bounds = array<i64: 1, 1>, scalar_prefetch = 0 : i64, scratch_operands = 0 : i64, tpu.core_type = #tpu.core_type<tc>, window_params = [{transform_indices = @transform_0, window_bounds = array<i64: 8, 1>}, {transform_indices = @transform_1, window_bounds = array<i64: 8, 1>}, {transform_indices = @transform_2, window_bounds = array<i64: 8, 256>}, {transform_indices = @transform_3, window_bounds = array<i64: 8, 256>}]} {
    %c0 = arith.constant 0 : index
    %c0_0 = arith.constant 0 : index
    %0 = vector.load %arg4[%c0, %c0_0] : memref<8x256xf32, #tpu.memory_space<vmem>>, vector<8x256xf32>
    %c0_1 = arith.constant 0 : index
    %c0_2 = arith.constant 0 : index
    %1 = vector.load %arg2[%c0_1, %c0_2] : memref<8x1xf32, #tpu.memory_space<vmem>>, vector<8x1xf32>
    %2 = vector.broadcast %1 : vector<8x1xf32> to vector<8x256xf32>
    %3 = arith.mulf %0, %2 : vector<8x256xf32>
    %c0_3 = arith.constant 0 : index
    %c0_4 = arith.constant 0 : index
    %4 = vector.load %arg3[%c0_3, %c0_4] : memref<8x1xf32, #tpu.memory_space<vmem>>, vector<8x1xf32>
    %5 = vector.broadcast %4 : vector<8x1xf32> to vector<8x256xf32>
    %6 = arith.addf %3, %5 : vector<8x256xf32>
    %c0_5 = arith.constant 0 : index
    %c0_6 = arith.constant 0 : index
    %7 = vector.load %arg5[%c0_5, %c0_6] : memref<8x256xf32, #tpu.memory_space<vmem>>, vector<8x256xf32>
    tpu.vector_store %arg5[%c0_5, %c0_6], %6 {strides = array<i32>} : memref<8x256xf32, #tpu.memory_space<vmem>>, vector<8x256xf32>,
    return
  }
  func.func @transform_0(%arg0: i32, %arg1: i32) -> (i32, i32) {
    %c0_i32 = arith.constant 0 : i32
    %c0_i32_0 = arith.constant 0 : i32
    return %arg0, %c0_i32 : i32, i32
  }
  func.func @transform_1(%arg0: i32, %arg1: i32) -> (i32, i32) {
    %c0_i32 = arith.constant 0 : i32
    %c0_i32_0 = arith.constant 0 : i32
    return %arg0, %c0_i32 : i32, i32
  }
  func.func @transform_2(%arg0: i32, %arg1: i32) -> (i32, i32) {
    %c0_i32 = arith.constant 0 : i32
    return %arg0, %arg1 : i32, i32
  }
  func.func @transform_3(%arg0: i32, %arg1: i32) -> (i32, i32) {
    %c0_i32 = arith.constant 0 : i32
    return %arg0, %arg1 : i32, i32
  }
}

</mosaic_0001>

<bundles_post_ra>
// kernel: tpu_custom_call.1
= control target key start
LH: loop header
LB: loop body
LE: loop exit
PB: predicated region body
PF: predicated region fallthrough
CT: control target
= control target key end

     0   :  { %8 = vsyncpa [#allocation3], 0  ;;  %s259_s0 = inlined_call_operand.hbm [shape: f32[8,1], index: 0, kind: input, shape index: {}]   ;;  %s260_s1 = inlined_call_operand.hbm [shape: f32[8,1], index: 1, kind: input, shape index: {}]   ;;  %s261_s2 = inlined_call_operand.hbm [shape: f32[8,256], index: 2, kind: input, shape index: {}]   ;;  %s262_s3 = inlined_call_operand.hbm [shape: f32[8,256], index: 3, kind: output, shape index: {}]  }
   0x1   :  { %9 = vsyncpa [#allocation6], 0 }
   0x2   :  { %10 = vsyncpa [#allocation4], 0  ;;  %s186_s12 = smov [#allocation5]   ;;  %s187_s14 = smov [#allocation2]  }
   0x3   :  { %s27_s13 = sshll.u32 %s186_s12, 4  ;;  %s17_s15 = sshll.u32 %s187_s14, 4  ;;  %s28_s13 = int_to_ptr.vmem [resolvable:$true] %s27_s13  ;;  %s18_s15 = int_to_ptr.vmem [resolvable:$true] %s17_s15 }
   0x4   :  { %s92_s18 = scalar_lea.hbm %s260_s1, 128 }
   0x5   :  { %p93_p0 = scmp.ne.s32.totalorder %s260_s1, %s92_s18  ;;  %p96_p1 = scmp.lt.u32.totalorder %s92_s18, %s260_s1 }
   0x7   :  { %p98_p2 = pnand %p96_p1, %p93_p0 }
   0x9   :  { %101 = shalt.err (!%p98_p2)
}
   0xa   :  { %s102_s23 = scalar_lea.vmem %s28_s13, 128  ;;  %p107_p4 = scmp.lt.s32.totalorder %s28_s13, %s28_s13 }
   0xb   :  { %p103_p3 = scmp.ne.s32.totalorder %s28_s13, %s102_s23  ;;  %p108_p5 = scmp.lt.s32.totalorder %s102_s23, %s102_s23 }
   0xd   :  { %p109_p6 = por %p108_p5, %p107_p4 }
   0xf   :  { %p110_p7 = pnand %p109_p6, %p103_p3 }
  0x11   :  { %113 = shalt.err (!%p110_p7)
}
  0x12   :  { %30 = dma.hbm_to_vmem [thread:$0]  %s260_s1, 128, %s28_s13, [#allocation6]  }
  0x13   :  { %s114_s28 = scalar_lea.hbm %s259_s0, 128 }
  0x14   :  { %p115_p8 = scmp.ne.s32.totalorder %s259_s0, %s114_s28  ;;  %p118_p9 = scmp.lt.u32.totalorder %s114_s28, %s259_s0 }
  0x16   :  { %p120_p10 = pnand %p118_p9, %p115_p8 }
  0x18   :  { %123 = shalt.err (!%p120_p10)
}
  0x19   :  { %s124_s6 = scalar_lea.vmem %s18_s15, 128  ;;  %p129_p12 = scmp.lt.s32.totalorder %s18_s15, %s18_s15 }
  0x1a   :  { %p125_p11 = scmp.ne.s32.totalorder %s18_s15, %s124_s6  ;;  %p130_p13 = scmp.lt.s32.totalorder %s124_s6, %s124_s6 }
  0x1c   :  { %p131_p0 = por %p130_p13, %p129_p12 }
  0x1e   :  { %p132_p1 = pnand %p131_p0, %p125_p11 }
  0x20   :  { %135 = shalt.err (!%p132_p1)
}
  0x21   :  { %20 = dma.hbm_to_vmem [thread:$0]  %s259_s0, 128, %s18_s15, [#allocation3]  }
  0x22   :  { %s188_s8 = smov [#allocation7]   ;;  %s136_s12 = scalar_lea.hbm %s261_s2, 256 }
  0x23   :  { %s37_s9 = sshll.u32 %s188_s8, 4  ;;  %p137_p2 = scmp.ne.s32.totalorder %s261_s2, %s136_s12  ;;  %s38_s9 = int_to_ptr.vmem [resolvable:$true] %s37_s9 }
  0x24   :  { %p140_p3 = scmp.lt.u32.totalorder %s136_s12, %s261_s2 }
  0x26   :  { %p142_p4 = pnand %p140_p3, %p137_p2 }
  0x28   :  { %145 = shalt.err (!%p142_p4)
}
  0x29   :  { %s146_s18 = scalar_lea.vmem %s38_s9, 256  ;;  %p151_p6 = scmp.lt.s32.totalorder %s38_s9, %s38_s9 }
  0x2a   :  { %p147_p5 = scmp.ne.s32.totalorder %s38_s9, %s146_s18  ;;  %p152_p7 = scmp.lt.s32.totalorder %s146_s18, %s146_s18 }
  0x2c   :  { %p153_p8 = por %p152_p7, %p151_p6 }
  0x2e   :  { %p154_p9 = pnand %p153_p8, %p147_p5 }
  0x30   :  { %157 = shalt.err (!%p154_p9)
}
  0x31   :  { %40 = dma.hbm_to_vmem [thread:$0]  %s261_s2, 256, %s38_s9, [#allocation6]  }
  0x32   :  { %180 = dma.done.wait [#allocation3], 128  }
  0x33   :  { %181 = vsyncadd [#allocation3], 4294967168 }
  0x34   :  { %182 = dma.done.wait [#allocation6], 384  }
  0x35   :  { %183 = vsyncadd [#allocation6], 4294966912  ;;  %v189_v0 = vmov 0   ;;  %v52_v1 = vld [vmem:[#allocation2] sm:$0xff]  ;;  %v60_v2 = vld [vmem:[#allocation5] sm:$0xff]  ;;  %s190_s19 = smov [#allocation8]  }
  0x36   :  { %91 = vset.pattern.permute.xlu0 %v189_v0  ;;  %v50_v4 = vld [vmem:[#allocation7] sm:$0xff]  ;;  %v51_v5 = vld [vmem:[#allocation7 + $0x8] sm:$0xff]  ;;  %s76_s20 = sshll.u32 %s190_s19, 4  ;;  %s77_s20 = int_to_ptr.vmem [resolvable:$true] %s76_s20 }
  0x37   :  { %55 = vperm.xlu0 %91, %v52_v1   ;;  %s158_s2 = scalar_lea.vmem %s77_s20, 256  ;;  %p163_p11 = scmp.lt.s32.totalorder %s77_s20, %s77_s20 }
  0x38   :  { %p159_p10 = scmp.ne.s32.totalorder %s77_s20, %s158_s2  ;;  %p164_p12 = scmp.lt.s32.totalorder %s158_s2, %s158_s2 }
  0x3a   :  { %p165_p13 = por %p164_p12, %p163_p11 }
  0x3b   :  { %63 = vperm.xlu0 %91, %v60_v2  }
  0x3c   :  { %p166_p0 = pnand %p165_p13, %p159_p10 }
  0xb6   :  { %v56_v3 = vpop.permute.xlu0 %55 }
  0xb7   :  { %v58_v6 = vmul.f32 %v56_v3, %v50_v4  ;;  %v59_v7 = vmul.f32 %v56_v3, %v51_v5 }
  0xba   :  { %v64_v8 = vpop.permute.xlu0 %63 }
  0xbb   :  { %v66_v9 = vadd.f32 %v64_v8, %v58_v6  ;;  %v67_v10 = vadd.f32 %v64_v8, %v59_v7 }
  0xbd   :  { %68 = vst [vmem:[#allocation8] sm:$0xff] %v66_v9  ;;  %69 = vst [vmem:[#allocation8 + $0x8] sm:$0xff] %v67_v10 }
  0xbe   :  { %169 = shalt.err (!%p166_p0)
}
  0xbf   :  { %s170_s23 = scalar_lea.hbm %s262_s3, 256 }
  0xc0   :  { %p171_p1 = scmp.ne.s32.totalorder %s262_s3, %s170_s23  ;;  %p174_p2 = scmp.lt.u32.totalorder %s170_s23, %s262_s3 }
  0xc2   :  { %p176_p3 = pnand %p174_p2, %p171_p1 }
  0xc4   :  { %179 = shalt.err (!%p176_p3)
}
  0xc5   :  { %79 = dma.vmem_to_hbm [thread:$0]  %s77_s20, 256, %s262_s3, [#allocation4]  }
  0xc6   :  { %184 = dma.done.wait [#allocation4], 256  }
  0xc7   :  { %185 = vsyncadd [#allocation4], 4294967040 }
  0xc8   :  { %83 = vsyncpa [#allocation3], 1 }
  0xc9   :  { %84 = vsyncpa [#allocation6], 1 }
  0xca   :  { %85 = vsyncpa [#allocation4], 1 }

</bundles_post_ra>
